<compile_context>
chip_gen: v5e
topology: v5e:2x2
jax: 0.10.0
libtpu: 0.0.40
codegen_flags: <defaults>
</compile_context>

<pallas_src>
import functools

import jax
import jax.numpy as jnp
from jax import lax
from jax.experimental import pallas as pl
from jax.experimental.pallas import tpu as pltpu


# ---------------------------------------------------------------------------
# Kernel 1: channel mean / max of (ta * x) over N = T*C, lane-dense on H*W.
# grid = (B, N // TN); N axis is "arbitrary" (accumulation), batch is "parallel".
# ---------------------------------------------------------------------------
def _sa_reduce_kernel(ta_ref, x_ref, avg_ref, mxo_ref, sum_ref, max_ref, *, inv_n):
    nb = pl.program_id(1)

    @pl.when(nb == 0)
    def _():
        sum_ref[...] = jnp.zeros(sum_ref.shape, jnp.float32)
        max_ref[...] = jnp.full(max_ref.shape, -jnp.inf, jnp.float32)

    # per-chunk upcast; sum accumulated in f32 (max is exact either way)
    y = x_ref[0].astype(jnp.float32) * ta_ref[0].astype(jnp.float32)  # (TN, HW)
    sum_ref[...] += jnp.sum(y, axis=0, keepdims=True)
    max_ref[...] = jnp.maximum(max_ref[...], jnp.max(y, axis=0, keepdims=True))

    @pl.when(nb == pl.num_programs(1) - 1)
    def _():
        avg_ref[0] = sum_ref[...] * inv_n        # multiply by precomputed 1/N (no divide)
        mxo_ref[0] = max_ref[...]


# ---------------------------------------------------------------------------
# Kernel 2: 3x3 conv (2 -> 1, pad=1, no bias) + sigmoid on the reduced planes.
# Planes are written once into zero-padded scratch; the 18 taps are full-window
# reads accumulated in registers; single output write.
# ---------------------------------------------------------------------------
def _sa_conv_kernel(w_ref, avg_ref, max_ref, mask_ref, pad_a, pad_b):
    H = mask_ref.shape[1]
    W = mask_ref.shape[2]

    pad_a[...] = jnp.zeros_like(pad_a)
    pad_b[...] = jnp.zeros_like(pad_b)
    pad_a[1:H + 1, 1:W + 1] = avg_ref[0].astype(jnp.float32)
    pad_b[1:H + 1, 1:W + 1] = max_ref[0].astype(jnp.float32)

    acc = jnp.zeros((H, W), jnp.float32)
    for c, pad in enumerate((pad_a, pad_b)):      # input channel 0 = avg, 1 = max
        for ki in range(3):
            for kj in range(3):
                w = w_ref[c * 9 + ki * 3 + kj]    # scalar from SMEM
                acc = acc + w * pad[ki:ki + H, kj:kj + W]

    mask_ref[0] = jax.nn.sigmoid(acc).astype(mask_ref.dtype)


# ---------------------------------------------------------------------------
# Kernel 3: out = relu(mask * ta * x), fused elementwise, 128-lane-dense stores.
# ---------------------------------------------------------------------------
def _sa_apply_kernel(ta_ref, mask_ref, x_ref, o_ref):
    x = x_ref[0].astype(jnp.float32)          # (TN, HW)
    ta = ta_ref[0].astype(jnp.float32)        # (TN, 1)
    m = mask_ref[0].astype(jnp.float32)       # (1, HW)
    y = (x * ta) * m
    o_ref[0] = jnp.maximum(y, 0.0).astype(o_ref.dtype)


def _pick_block_n(n, hw, itemsize=4, budget_bytes=4 << 20):
    """Largest multiple-of-8 divisor of n keeping double-buffered (TN, HW) tiles small."""
    cap = max(8, budget_bytes // (2 * hw * itemsize))
    if n <= cap or n % 8 != 0:
        return n
    tn = min(n, (cap // 8) * 8)
    while tn >= 8:
        if n % tn == 0:
            return tn
        tn -= 8
    return n


def _time_attention(x, mlp_w1, mlp_w2):
    """TimeAttention: global avg/max pool over (C,H,W) + shared 1x1x1 MLP + sigmoid.

    Left to XLA on purpose: one streaming reduction + tiny matmuls (not a bottleneck).
    mlp_w1: (T//r, T)   -- Conv3d(T, T//r, 1, bias=False) weight reshaped
    mlp_w2: (T, T//r)   -- Conv3d(T//r, T, 1, bias=False) weight reshaped
    """
    avg = jnp.mean(x, axis=(2, 3, 4))                         # (B, T)
    mx = jnp.max(x, axis=(2, 3, 4))                           # (B, T)

    def mlp(v):
        return jnp.maximum(v @ mlp_w1.T, 0.0) @ mlp_w2.T

    return jax.nn.sigmoid(mlp(avg) + mlp(mx))                 # (B, T)


def tsa_forward(x, ta_mlp_w1, ta_mlp_w2, sa_conv_w, *, block_n=None):
    """TSA forward. x: (B,T,C,H,W); sa_conv_w: (1,2,3,3) OIHW. Returns (B,T,C,H,W)."""
    b, t, c, h, w = x.shape
    n = t * c
    hw = h * w

    # --- TimeAttention scale (B, T) -> per-channel scale (B, N, 1) ---
    ta = _time_attention(x, ta_mlp_w1, ta_mlp_w2)                         # (B, T)
    ta_n = jnp.repeat(ta, c, axis=1).reshape(b, n, 1).astype(jnp.float32)  # (B, N, 1)

    # lane-dense layout for the streaming SA path
    xf = x.reshape(b, n, hw)                                               # (B, N, HW)

    if block_n is None:
        block_n = _pick_block_n(n, hw)
    if block_n >= n or n % block_n != 0 or block_n % 8 != 0:
        block_n = n
    n_blocks = n // block_n

    # --- SA stage 1: channel mean / max of (ta * x) over N ---
    avg_p, max_p = pl.pallas_call(
        functools.partial(_sa_reduce_kernel, inv_n=1.0 / n),
        out_shape=(jax.ShapeDtypeStruct((b, 1, hw), jnp.float32),
                   jax.ShapeDtypeStruct((b, 1, hw), jnp.float32)),
        grid=(b, n_blocks),
        in_specs=[
            pl.BlockSpec((1, block_n, 1), lambda bi, ni: (bi, ni, 0)),     # ta scale
            pl.BlockSpec((1, block_n, hw), lambda bi, ni: (bi, ni, 0)),    # x tile
        ],
        out_specs=[
            pl.BlockSpec((1, 1, hw), lambda bi, ni: (bi, 0, 0)),
            pl.BlockSpec((1, 1, hw), lambda bi, ni: (bi, 0, 0)),
        ],
        scratch_shapes=[pltpu.VMEM((1, hw), jnp.float32),
                        pltpu.VMEM((1, hw), jnp.float32)],
        compiler_params=pltpu.CompilerParams(
            dimension_semantics=("parallel", "arbitrary")),
    )(ta_n, xf)

    # --- SA stage 2: tiny 3x3 conv + sigmoid on the reduced (H, W) planes ---
    wf = sa_conv_w.reshape(-1).astype(jnp.float32)     # (18,), index = c*9 + ki*3 + kj
    avg4 = avg_p.reshape(b, h, w)
    max4 = max_p.reshape(b, h, w)
    mask = pl.pallas_call(
        _sa_conv_kernel,
        out_shape=jax.ShapeDtypeStruct((b, h, w), jnp.float32),
        grid=(b,),
        in_specs=[
            pl.BlockSpec(memory_space=pltpu.MemorySpace.SMEM),             # conv weights
            pl.BlockSpec((1, h, w), lambda bi: (bi, 0, 0)),                # avg plane
            pl.BlockSpec((1, h, w), lambda bi: (bi, 0, 0)),                # max plane
        ],
        out_specs=pl.BlockSpec((1, h, w), lambda bi: (bi, 0, 0)),
        scratch_shapes=[pltpu.VMEM((h + 2, w + 2), jnp.float32),
                        pltpu.VMEM((h + 2, w + 2), jnp.float32)],
        compiler_params=pltpu.CompilerParams(dimension_semantics=("parallel",)),
    )(wf, avg4, max4)

    # --- SA stage 3: out = relu(mask * ta * x) ---
    mask3 = mask.reshape(b, 1, hw)
    out = pl.pallas_call(
        _sa_apply_kernel,
        out_shape=jax.ShapeDtypeStruct((b, n, hw), x.dtype),
        grid=(b, n_blocks),
        in_specs=[
            pl.BlockSpec((1, block_n, 1), lambda bi, ni: (bi, ni, 0)),     # ta scale
            pl.BlockSpec((1, 1, hw), lambda bi, ni: (bi, 0, 0)),           # spatial mask
            pl.BlockSpec((1, block_n, hw), lambda bi, ni: (bi, ni, 0)),    # x tile
        ],
        out_specs=pl.BlockSpec((1, block_n, hw), lambda bi, ni: (bi, ni, 0)),
        compiler_params=pltpu.CompilerParams(
            dimension_semantics=("parallel", "parallel")),
    )(ta_n, mask3, xf)

    return out.reshape(b, t, c, h, w)


def tsa_ref(x, ta_mlp_w1, ta_mlp_w2, sa_conv_w):
    """Pure-JAX reference mirroring the PyTorch TSA module."""
    b, t, c, h, w = x.shape
    # TimeAttention
    avg = jnp.mean(x, axis=(2, 3, 4))
    mx = jnp.max(x, axis=(2, 3, 4))

    def mlp(v):
        return jnp.maximum(v @ ta_mlp_w1.T, 0.0) @ ta_mlp_w2.T

    ta = jax.nn.sigmoid(mlp(avg) + mlp(mx))[:, :, None, None, None]   # (B,T,1,1,1)
    out = ta * x
    # SpatialAttention
    xf = out.reshape(b, -1, h, w)
    avg2 = jnp.mean(xf, axis=1, keepdims=True)
    mx2 = jnp.max(xf, axis=1, keepdims=True)
    cat = jnp.concatenate([avg2, mx2], axis=1)                        # (B, 2, H, W)
    conv = lax.conv_general_dilated(
        cat, sa_conv_w, window_strides=(1, 1), padding="SAME",
        dimension_numbers=("NCHW", "OIHW", "NCHW"))
    sa = jax.nn.sigmoid(conv)[:, None]                                # (B,1,1,H,W)
    out = sa * out
    return jnp.maximum(out, 0.0)


if __name__ == "__main__":
    key = jax.random.PRNGKey(0)
    kx, kw1, kw2, kwc = jax.random.split(key, 4)

    # Small shapes consistent with the module: timeWindows = 8, ratio = 4.
    B, T, C, H, W = 2, 8, 4, 16, 16
    x = jax.random.normal(kx, (B, T, C, H, W), dtype=jnp.float32)

    # Conv3d(T, T//4, 1, bias=False) / Conv3d(T//4, T, 1, bias=False) weights (reshaped)
    ta_mlp_w1 = 0.3 * jax.random.normal(kw1, (T // 4, T), dtype=jnp.float32)
    ta_mlp_w2 = 0.3 * jax.random.normal(kw2, (T, T // 4), dtype=jnp.float32)
    # Conv2d(2, 1, 3, padding=1, bias=False) weight, OIHW
    sa_conv_w = 0.1 * jax.random.normal(kwc, (1, 2, 3, 3), dtype=jnp.float32)

    # block_n=8 exercises the blocked-N accumulation path (4 reduction steps).
    out = jax.block_until_ready(tsa_forward(x, ta_mlp_w1, ta_mlp_w2, sa_conv_w, block_n=8))
    ref = jax.block_until_ready(tsa_ref(x, ta_mlp_w1, ta_mlp_w2, sa_conv_w))

    assert out.shape == (B, T, C, H, W), out.shape
    err = float(jnp.max(jnp.abs(out - ref)))
    assert jnp.allclose(out, ref, atol=2e-5, rtol=2e-5), err
    print("KERNEL_OK")
</pallas_src>

<mosaic_0001>
module attributes {stable_mosaic.version = 11 : i64} {
  func.func @_sa_reduce_kernel(%arg0: i32, %arg1: i32, %arg2: memref<1x8x1xf32, #tpu.memory_space<vmem>>, %arg3: memref<1x8x256xf32, #tpu.memory_space<vmem>>, %arg4: memref<1x1x256xf32, #tpu.memory_space<vmem>>, %arg5: memref<1x1x256xf32, #tpu.memory_space<vmem>>, %arg6: memref<1x256xf32, #tpu.memory_space<vmem>>, %arg7: memref<1x256xf32, #tpu.memory_space<vmem>>) attributes {dimension_semantics = [#tpu.dimension_semantics<parallel>, #tpu.dimension_semantics<arbitrary>], iteration_bounds = array<i64: 2, 4>, scalar_prefetch = 0 : i64, scratch_operands = 2 : i64, tpu.core_type = #tpu.core_type<tc>, window_params = [{transform_indices = @transform_0, window_bounds = array<i64: 1, 8, 1>}, {transform_indices = @transform_1, window_bounds = array<i64: 1, 8, 256>}, {transform_indices = @transform_2, window_bounds = array<i64: 1, 1, 256>}, {transform_indices = @transform_3, window_bounds = array<i64: 1, 1, 256>}]} {
    %c0_i32 = arith.constant 0 : i32
    %0 = arith.cmpi eq, %arg1, %c0_i32 : i32
    %1 = arith.extui %0 : i1 to i32
    %c0_i32_0 = arith.constant 0 : i32
    %2 = arith.cmpi ne, %1, %c0_i32_0 : i32
    scf.if %2 {
      %cst_16 = arith.constant 0.000000e+00 : f32
      %22 = vector.broadcast %cst_16 : f32 to vector<1x256xf32>
      %c0_17 = arith.constant 0 : index
      %c0_18 = arith.constant 0 : index
      %23 = vector.load %arg6[%c0_17, %c0_18] : memref<1x256xf32, #tpu.memory_space<vmem>>, vector<1x256xf32>
      tpu.vector_store %arg6[%c0_17, %c0_18], %22 {strides = array<i32>} : memref<1x256xf32, #tpu.memory_space<vmem>>, vector<1x256xf32>,
      %cst_19 = arith.constant 0xFF800000 : f32
      %24 = vector.broadcast %cst_19 : f32 to vector<1x256xf32>
      %c0_20 = arith.constant 0 : index
      %c0_21 = arith.constant 0 : index
      %25 = vector.load %arg7[%c0_20, %c0_21] : memref<1x256xf32, #tpu.memory_space<vmem>>, vector<1x256xf32>
      tpu.vector_store %arg7[%c0_20, %c0_21], %24 {strides = array<i32>} : memref<1x256xf32, #tpu.memory_space<vmem>>, vector<1x256xf32>,
    } else {
    }
    %c0 = arith.constant 0 : index
    %c0_1 = arith.constant 0 : index
    %c0_2 = arith.constant 0 : index
    %3 = vector.load %arg3[%c0, %c0_1, %c0_2] : memref<1x8x256xf32, #tpu.memory_space<vmem>>, vector<1x8x256xf32>
    %4 = vector.shape_cast %3 : vector<1x8x256xf32> to vector<8x256xf32>
    %c0_3 = arith.constant 0 : index
    %c0_4 = arith.constant 0 : index
    %c0_5 = arith.constant 0 : index
    %5 = vector.load %arg2[%c0_3, %c0_4, %c0_5] : memref<1x8x1xf32, #tpu.memory_space<vmem>>, vector<1x8x1xf32>
    %6 = vector.shape_cast %5 : vector<1x8x1xf32> to vector<8x1xf32>
    %7 = vector.broadcast %6 : vector<8x1xf32> to vector<8x256xf32>
    %8 = arith.mulf %4, %7 : vector<8x256xf32>
    %c0_6 = arith.constant 0 : index
    %c0_7 = arith.constant 0 : index
    %9 = vector.load %arg6[%c0_6, %c0_7] : memref<1x256xf32, #tpu.memory_space<vmem>>, vector<1x256xf32>
    %cst = arith.constant dense<0.000000e+00> : vector<256xf32>
    %10 = vector.multi_reduction <add>, %8, %cst [0] : vector<8x256xf32> to vector<256xf32>
    %11 = vector.shape_cast %10 : vector<256xf32> to vector<1x256xf32>
    %12 = arith.addf %9, %11 : vector<1x256xf32>
    %c0_8 = arith.constant 0 : index
    %c0_9 = arith.constant 0 : index
    %13 = vector.load %arg6[%c0_8, %c0_9] : memref<1x256xf32, #tpu.memory_space<vmem>>, vector<1x256xf32>
    tpu.vector_store %arg6[%c0_8, %c0_9], %12 {strides = array<i32>} : memref<1x256xf32, #tpu.memory_space<vmem>>, vector<1x256xf32>,
    %c0_10 = arith.constant 0 : index
    %c0_11 = arith.constant 0 : index
    %14 = vector.load %arg7[%c0_10, %c0_11] : memref<1x256xf32, #tpu.memory_space<vmem>>, vector<1x256xf32>
    %cst_12 = arith.constant dense<0xFF800000> : vector<256xf32>
    %15 = vector.multi_reduction <maximumf>, %8, %cst_12 [0] : vector<8x256xf32> to vector<256xf32>
    %16 = vector.shape_cast %15 : vector<256xf32> to vector<1x256xf32>
    %17 = arith.maximumf %14, %16 : vector<1x256xf32>
    %c0_13 = arith.constant 0 : index
    %c0_14 = arith.constant 0 : index
    %18 = vector.load %arg7[%c0_13, %c0_14] : memref<1x256xf32, #tpu.memory_space<vmem>>, vector<1x256xf32>
    tpu.vector_store %arg7[%c0_13, %c0_14], %17 {strides = array<i32>} : memref<1x256xf32, #tpu.memory_space<vmem>>, vector<1x256xf32>,
    %c3_i32 = arith.constant 3 : i32
    %19 = arith.cmpi eq, %arg1, %c3_i32 : i32
    %20 = arith.extui %19 : i1 to i32
    %c0_i32_15 = arith.constant 0 : i32
    %21 = arith.cmpi ne, %20, %c0_i32_15 : i32
    scf.if %21 {
      %c0_16 = arith.constant 0 : index
      %c0_17 = arith.constant 0 : index
      %22 = vector.load %arg6[%c0_16, %c0_17] : memref<1x256xf32, #tpu.memory_space<vmem>>, vector<1x256xf32>
      %cst_18 = arith.constant 3.125000e-02 : f32
      %23 = vector.broadcast %cst_18 : f32 to vector<1x256xf32>
      %24 = arith.mulf %22, %23 : vector<1x256xf32>
      %c0_19 = arith.constant 0 : index
      %c0_20 = arith.constant 0 : index
      %c0_21 = arith.constant 0 : index
      %25 = vector.load %arg4[%c0_19, %c0_20, %c0_21] : memref<1x1x256xf32, #tpu.memory_space<vmem>>, vector<1x1x256xf32>
      %26 = vector.shape_cast %25 : vector<1x1x256xf32> to vector<1x256xf32>
      %27 = vector.shape_cast %24 : vector<1x256xf32> to vector<1x1x256xf32>
      tpu.vector_store %arg4[%c0_19, %c0_20, %c0_21], %27 {strides = array<i32>} : memref<1x1x256xf32, #tpu.memory_space<vmem>>, vector<1x1x256xf32>,
      %c0_22 = arith.constant 0 : index
      %c0_23 = arith.constant 0 : index
      %28 = vector.load %arg7[%c0_22, %c0_23] : memref<1x256xf32, #tpu.memory_space<vmem>>, vector<1x256xf32>
      %c0_24 = arith.constant 0 : index
      %c0_25 = arith.constant 0 : index
      %c0_26 = arith.constant 0 : index
      %29 = vector.load %arg5[%c0_24, %c0_25, %c0_26] : memref<1x1x256xf32, #tpu.memory_space<vmem>>, vector<1x1x256xf32>
      %30 = vector.shape_cast %29 : vector<1x1x256xf32> to vector<1x256xf32>
      %31 = vector.shape_cast %28 : vector<1x256xf32> to vector<1x1x256xf32>
      tpu.vector_store %arg5[%c0_24, %c0_25, %c0_26], %31 {strides = array<i32>} : memref<1x1x256xf32, #tpu.memory_space<vmem>>, vector<1x1x256xf32>,
    } else {
    }
    return
  }
  func.func @transform_0(%arg0: i32, %arg1: i32) -> (i32, i32, i32) {
    %c0_i32 = arith.constant 0 : i32
    %c0_i32_0 = arith.constant 0 : i32
    return %arg0, %arg1, %c0_i32 : i32, i32, i32
  }
  func.func @transform_1(%arg0: i32, %arg1: i32) -> (i32, i32, i32) {
    %c0_i32 = arith.constant 0 : i32
    %c0_i32_0 = arith.constant 0 : i32
    return %arg0, %arg1, %c0_i32 : i32, i32, i32
  }
  func.func @transform_2(%arg0: i32, %arg1: i32) -> (i32, i32, i32) {
    %c0_i32 = arith.constant 0 : i32
    %c0_i32_0 = arith.constant 0 : i32
    %c0_i32_1 = arith.constant 0 : i32
    return %arg0, %c0_i32, %c0_i32_0 : i32, i32, i32
  }
  func.func @transform_3(%arg0: i32, %arg1: i32) -> (i32, i32, i32) {
    %c0_i32 = arith.constant 0 : i32
    %c0_i32_0 = arith.constant 0 : i32
    %c0_i32_1 = arith.constant 0 : i32
    return %arg0, %c0_i32, %c0_i32_0 : i32, i32, i32
  }
}

</mosaic_0001>

<bundles_post_ra>
// kernel: tpu_custom_call.1
= control target key start
LH: loop header
LB: loop body
LE: loop exit
PB: predicated region body
PF: predicated region fallthrough
CT: control target
= control target key end

     0   :  { %9 = vsyncpa [#allocation5], 0  ;;  %s1037_s0 = inlined_call_operand.vmem [shape: f32[2,32,1], index: 0, kind: input, shape index: {}]   ;;  %s1038_s1 = inlined_call_operand.hbm [shape: f32[2,32,256], index: 1, kind: input, shape index: {}]   ;;  %s1039_s2 = inlined_call_operand.hbm [shape: f32[2,1,256], index: 2, kind: output, shape index: {0}]   ;;  %s1040_s3 = inlined_call_operand.hbm [shape: f32[2,1,256], index: 3, kind: output, shape index: {1}]  }
   0x1   :  { %11 = vsyncpa [#allocation5 + $0x1], 0 }
   0x2   :  { %12 = vsyncpa [#allocation6], 0 }
   0x3   :  { %14 = vsyncpa [#allocation6 + $0x1], 0 }
   0x4   :  { %15 = vsyncpa [#allocation9], 0 }
   0x5   :  { %17 = vsyncpa [#allocation9 + $0x1], 0  ;;  %s833_s12 = smov 0   ;;  %s835_s13 = smov 0  }
   0x6   :  { %s837_s14 = smov 0   ;;  %s839_s15 = smov 0  }
   0x7   :  { %s841_s16 = smov 0   ;;  %s843_s17 = smov 0  }
   0x8   :  { %s845_s18 = smov 0   ;;  %s847_s19 = smov 0  }
   0x9   :  { %s849_s20 = smov 0   ;;  %s851_s21 = smov 0  }
   0xa   :  { %s853_s22 = smov 0  }
   0xb LB: > { %s491_s23 = sadd.s32 4294967295, %s808_s22   ;;  %s492_s24 = sadd.s32 4294967294, %s808_s22   ;;  %s808_s22 = sphi %s853_s22, %s23_s22   ;;  %s804_s21 = sphi %s851_s21, %s1064_s21   ;;  %s800_s20 = sphi %s849_s20, %s1063_s20   ;;  %s796_s19 = sphi %s847_s19, %s1062_s19   ;;  %s792_s18 = sphi %s845_s18, %s1061_s18   ;;  %s788_s17 = sphi %s843_s17, %s1060_s17   ;;  %s784_s16 = sphi %s841_s16, %s1059_s16   ;;  %s780_s15 = sphi %s839_s15, %s1058_s15   ;;  %s776_s14 = sphi %s837_s14, %s1057_s14   ;;  %s772_s13 = sphi %s835_s13, %s1056_s13   ;;  %s768_s12 = sphi %s833_s12, %s1055_s12  }
   0xc   : > { %s32_s25 = sadd.s32 1, %s800_s20  ;;  %s35_s26 = sadd.s32 1, %s804_s21 }
   0xd   : > { %p33_p0 = scmp.ge.s32.totalorder %s32_s25, 4  ;;  %s72_s27 = sadd.s32 1, %s788_s17 }
   0xe   : > { %p79_p1 = scmp.ne.s32.totalorder %s788_s17, %s784_s16  ;;  %p80_p2 = scmp.eq.s32.totalorder %s808_s22, 0 }
   0xf   : > { %s1066_s25 = smov (%p33_p0, %s32_s25), 0  ;;  %s1068_s26 = smov (!%p33_p0, %s35_s26), %s804_s21 }
  0x10   : > { %1043 = sst [smem:[#allocation13_spill]] %s1066_s25  ;;  %s68_s28 = ssub.s32 %s800_s20, %s1066_s25 }
  0x11   : > { %p899_p3 = por %p80_p2, %p79_p1  ;;  %p37_p4 = scmp.ge.s32.totalorder %s1068_s26, 2 }
  0x12   : > { %p85_p5 = scmp.ne.s32.totalorder %s784_s16, %s780_s15  ;;  %p86_p6 = scmp.eq.s32.totalorder %s491_s23, 0 }
  0x13   : > { %s98_s30 = sadd.s32 1, %s776_s14  ;;  %s1070_s26 = smov (%p37_p4, %s1068_s26), 0 }
  0x14   : > { %1045 = sst [smem:[#allocation14_spill]] %s1070_s26  ;;  %p907_p7 = por %p86_p6, %p85_p5 }
  0x15   : > { %p108_p8 = scmp.ne.s32.totalorder %s776_s14, %s772_s13  ;;  %s67_s5 = ssub.s32 %s804_s21, %s1070_s26 }
  0x16   : > { %p109_p9 = scmp.eq.s32.totalorder %s491_s23, 7  ;;  %s69_s6 = sor.u32 %s68_s28, %s67_s5 }
  0x17   : > { %p96_p10 = scmp.eq.s32.totalorder %s67_s5, 0  ;;  %p70_p11 = scmp.eq.s32.totalorder %s69_s6, 0 }
  0x18   : > { %p915_p12 = por %p109_p9, %p108_p8  ;;  %p114_p13 = scmp.ne.s32.totalorder %s772_s13, %s768_s12 }
  0x19   : > { %s920_s8 = scalar_select %p96_p10, %s776_s14, %s98_s30  }
  0x1a   : > { %s923_s9 = scalar_select %p70_p11, %s788_s17, %s72_s27  }
  0x1b   : > { %1048 = sst [smem:[#allocation15_spill]] %s920_s8  ;;  %p115_p0 = scmp.eq.s32.totalorder %s492_s24, 7 }
  0x1c   : > { %1049 = sst [smem:[#allocation16_spill]] %s923_s9  ;;  %p530_p1 = scmp.lt.s32.totalorder %s808_s22, 8 }
  0x1d   : > { %p928_p2 = por %p115_p0, %p114_p13  ;;  %s172_s11 = sand.u32 1, %s788_s17  }
  0x1e   : > { %s495_s15 = sshll.u32 %s172_s11, 4  ;;  %s496_s23 = sshll.u32 %s800_s20, 1 }
  0x1f   : > { %s497_s28 = sshll.u32 %s804_s21, 3  ;;  %s176_s5 = scalar_lea.vmem [#allocation4], %s495_s15 }
  0x20   : > { %s187_s6 = sshll.u32 %s176_s5, 4  ;;  %s181_s26 = sadd.s32 %s497_s28, %s496_s23  ;;  %s188_s6 = int_to_ptr.vmem [resolvable:$true] %s187_s6 }
  0x21   : > { %s498_s30 = sshll.u32 %s181_s26, 3  ;;  %p520_p4 = pnand %p530_p1, %p899_p3 }
  0x22   : > { %s183_s24 = scalar_lea.hbm %s1038_s1, %s498_s30  ;;  %p499_p5 = scmp.ge.s32.totalorder %s808_s22, 1 }
  0x23   : > { %s185_s9 = sshll.u32 %s183_s24, 4  ;;  %p192_p6 = scmp.lt.s32.totalorder %s808_s22, 9  ;;  %s186_s9 = int_to_ptr.hbm [resolvable:$true] %s185_s9 }
  0x24   : > { %s173_s8 = scalar_lea.sflag [#allocation5], %s172_s11 }
  0x25   : > { %522 = dma.hbm_to_vmem [thread:$0]  (!%p520_p4), %s186_s9, 256, %s188_s6, %s173_s8  }
  0x26   : > { %p193_p8 = pnand %p499_p5, %p192_p6 }
  0x27   : > { %s198_s15 = sand.u32 (!%p193_p8), 1, %s784_s16  }
  0x28   : > { %196 = sbr.rel (%p193_p8) target bundleno = 240 (0xf0), region = 28  ;;  %s943_s23 = sshll.u32 (!%p193_p8), %s198_s15, 4 }
  0x29   : > { %s199_s26 = scalar_lea.sflag (!%p193_p8), [#allocation5], %s198_s15  ;;  %s202_s29 = scalar_lea.vmem (!%p193_p8), [#allocation4], %s943_s23 }
  0x2d   : > { %755 = dma.done.wait (%p907_p7), %s199_s26, 256  }
  0x2e   : > { %757 = vsyncadd (%p907_p7), %s199_s26, 4294967040  ;;  %s951_s25 = sand.u32 1, %s772_s13   ;;  %p239_p3 = scmp.lt.s32.totalorder %s796_s19, 1 }
  0x2f   : > { %s501_s8 = sshll.u32 %s951_s25, 1  ;;  %p241_p9 = scmp.lt.s32.totalorder %s792_s18, 3 }
  0x30   : > { %s240_s9 = scalar_select %p239_p3, %s796_s19, 1 }
  0x31   : > { %s242_s11 = scalar_select %p241_p9, %s792_s18, 3 }
  0x32   : > { %s503_s28 = sshll.u32 %s240_s9, 2  ;;  %s961_s24 = scalar_lea.vmem [#allocation7], %s501_s8 }
  0x33   : > { %s244_s5 = sadd.s32 %s503_s28, %s242_s11  ;;  %s963_s15 = scalar_lea.vmem [#allocation8], %s501_s8 }
  0x34   : > { %s504_s6 = sshll.u32 %s244_s5, 3  ;;  %p505_p7 = scmp.ne.s32.totalorder %s792_s18, 0 }
  0x35   : > { %s246_s4 = scalar_lea.vmem %s1037_s0, %s504_s6 }
  0x36   : > { %250 = sbr.rel (%p505_p7) target bundleno = 64 (0x40), region = 36 }
  0x3b   : > { %v251_v0 = vlaneseq  ;;  %v810_v1 = vmov 0.0   ;;  %v811_v2 = vmov -inf  }
  0x3d   : > { %vm253_vm0 = vcmp.lt.s32.totalorder %v251_v0, 256 }
  0x3e   : > { %255 = vst.msk [vmem:[#allocation2] sm:$0x3] %vm253_vm0, %v810_v1 }
  0x3f   : > { %256 = vst.msk [vmem:[#allocation3] sm:$0x3] %vm253_vm0, %v811_v2 }
  0x40 PF: > { %v259_v3 = vld [vmem:[%s246_s4] sm:$0xff]  ;;  %v812_v4 = vmov 0   ;;  %v287_v28 = vlaneseq  ;;  %vm283_vm1 = vcmask 1040384   ;;  %p506_p10 = scmp.ne.s32.totalorder %s792_s18, 3 }
  0x41   : > { %623 = vset.pattern.permute.xlu0 %v812_v4  ;;  %v257_v5 = vld [vmem:[%s202_s29] sm:$0xff]  ;;  %v258_v6 = vld [vmem:[%s202_s29 + $0x8] sm:$0xff] }
  0x42   : > { %262 = vperm.xlu0 %623, %v259_v3   ;;  %vm289_vm2 = vcmp.lt.s32.totalorder %v287_v28, 256 }
  0x45   : > { %v267_v31 = vld [vmem:[#allocation2] sm:$0x3] }
  0x46   : > { %v292_v32 = vld [vmem:[#allocation3] sm:$0x3] }
  0xb4   : > { %v263_v7 = vpop.permute.xlu0 %262 }
  0xb5   : > { %v265_v8 = vmul.f32 %v263_v7, %v257_v5  ;;  %v266_v9 = vmul.f32 %v263_v7, %v258_v6 }
  0xb7   : > { %v268_v10 = vrot.slane %v265_v8, 4  ;;  %v274_v11 = vrot.slane %v266_v9, 4 }
  0xb9   : > { %v269_v12 = vadd.f32 %v268_v10, %v265_v8  ;;  %v275_v13 = vadd.f32 %v274_v11, %v266_v9  ;;  %v294_v14 = vmax.f32 %v265_v8, %v268_v10  ;;  %v300_v15 = vmax.f32 %v266_v9, %v274_v11 }
  0xbb   : > { %v270_v16 = vrot.slane %v269_v12, 2  ;;  %v276_v17 = vrot.slane %v275_v13, 2  ;;  %v295_v18 = vrot.slane %v294_v14, 2  ;;  %v301_v19 = vrot.slane %v300_v15, 2 }
  0xbd   : > { %v271_v20 = vadd.f32 %v270_v16, %v269_v12  ;;  %v277_v21 = vadd.f32 %v276_v17, %v275_v13  ;;  %v296_v22 = vmax.f32 %v294_v14, %v295_v18  ;;  %v302_v23 = vmax.f32 %v300_v15, %v301_v19 }
  0xbf   : > { %v272_v24 = vrot.slane %v271_v20, 1  ;;  %v278_v25 = vrot.slane %v277_v21, 1  ;;  %v297_v26 = vrot.slane %v296_v22, 1  ;;  %v303_v27 = vrot.slane %v302_v23, 1 }
  0xc1   : > { %v279_v29 = vadd.f32 %v278_v25, %v277_v21  ;;  %v304_v30 = vmax.f32 %v302_v23, %v303_v27  ;;  %v273_v33 = vadd.f32 %v272_v24, %v271_v20  ;;  %v298_v35 = vmax.f32 %v296_v22, %v297_v26 }
  0xc3   : > { %v282_v34 = vrot.slane %v279_v29, 7  ;;  %v307_v36 = vrot.slane %v304_v30, 7 }
  0xc5   : > { %v284_v37 = vsel %vm283_vm1, %v273_v33, %v282_v34  ;;  %v308_v38 = vsel %vm283_vm1, %v298_v35, %v307_v36  ;;  %315 = sbr.rel (%p506_p10) target bundleno = 211 (0xd3), region = 40 }
  0xc6   : > { %v286_v39 = vadd.f32 %v284_v37, %v267_v31  ;;  %v310_v40 = vmax.f32 %v292_v32, %v308_v38 }
  0xc8   : > { %291 = vst.msk [vmem:[#allocation2] sm:$0x3] %vm289_vm2, %v286_v39 }
  0xc9   : > { %311 = vst.msk [vmem:[#allocation3] sm:$0x3] %vm289_vm2, %v310_v40 }
  0xcf   : > { %v316_v41 = vld [vmem:[#allocation2] sm:$0x3] }
  0xd0   : > { %v319_v42 = vld [vmem:[#allocation3] sm:$0x3]  ;;  %v317_v43 = vmul.f32 0.03125, %v316_v41 }
  0xd1   : > { %320 = vst.msk [vmem:[%s963_s15] sm:$0x3] %vm289_vm2, %v319_v42 }
  0xd2   : > { %318 = vst.msk [vmem:[%s961_s24] sm:$0x3] %vm289_vm2, %v317_v43 }
  0xd3 PF: > { %s509_s23 = sshll.u32 %s796_s19, 1  ;;  %s339_s9 = sshll.u32 %s961_s24, 4  ;;  %s340_s9 = int_to_ptr.vmem [resolvable:$true] %s339_s9 }
  0xd4   : > { %s337_s8 = scalar_lea.hbm %s1039_s2, %s509_s23  ;;  %s322_s11 = scalar_lea.sflag [#allocation6], %s951_s25 }
  0xd5   : > { %s341_s18 = sshll.u32 %s337_s8, 4  ;;  %s674_s19 = scalar_lea.hbm %s1039_s2, 4  ;;  %s342_s18 = int_to_ptr.hbm [resolvable:$true] %s341_s18 }
  0xd6   : > { %s668_s28 = sshra.s32 %s342_s18, 4  ;;  %s669_s28 = int_to_ptr.hbm [resolvable:$true] %s668_s28 }
  0xd7   : > { %s670_s5 = scalar_lea.hbm %s669_s28, 2  ;;  %p675_p1 = scmp.lt.s32.totalorder %s669_s28, %s1039_s2 }
  0xd8   : > { %p671_p11 = scmp.ne.s32.totalorder %s669_s28, %s670_s5  ;;  %p676_p4 = scmp.lt.s32.totalorder %s674_s19, %s670_s5 }
  0xda   : > { %p672_p13 = pnand %p671_p11, %p915_p12  ;;  %p677_p5 = por %p676_p4, %p675_p1 }
  0xdc   : > { %p673_p0 = pneg %p672_p13 }
  0xde   : > { %p678_p6 = pnand %p677_p5, %p673_p0 }
  0xe0   : > { %681 = shalt.err (!%p678_p6)
}
  0xe1   : > { %515 = dma.vmem_to_hbm [thread:$0]  (%p915_p12), %s340_s9, 32, %s342_s18, %s322_s11  }
  0xe2   : > { %s351_s29 = scalar_lea.hbm %s1040_s3, %s509_s23  ;;  %s353_s8 = sshll.u32 %s963_s15, 4  ;;  %s354_s8 = int_to_ptr.vmem [resolvable:$true] %s353_s8 }
  0xe3   : > { %s355_s6 = sshll.u32 %s351_s29, 4  ;;  %s327_s30 = scalar_lea.sflag [#allocation9], %s951_s25  ;;  %s356_s6 = int_to_ptr.hbm [resolvable:$true] %s355_s6 }
  0xe4   : > { %s696_s28 = sshra.s32 %s356_s6, 4  ;;  %s702_s9 = scalar_lea.hbm %s1040_s3, 4  ;;  %s697_s28 = int_to_ptr.hbm [resolvable:$true] %s696_s28 }
  0xe5   : > { %s698_s5 = scalar_lea.hbm %s697_s28, 2  ;;  %p703_p7 = scmp.lt.s32.totalorder %s697_s28, %s1040_s3 }
  0xe6   : > { %p699_p8 = scmp.ne.s32.totalorder %s697_s28, %s698_s5  ;;  %p704_p10 = scmp.lt.s32.totalorder %s702_s9, %s698_s5 }
  0xe8   : > { %p700_p3 = pnand %p699_p8, %p915_p12  ;;  %p705_p11 = por %p704_p10, %p703_p7 }
  0xea   : > { %p701_p9 = pneg %p700_p3 }
  0xec   : > { %p706_p13 = pnand %p705_p11, %p701_p9 }
  0xee   : > { %709 = shalt.err (!%p706_p13)
}
  0xef   : > { %516 = dma.vmem_to_hbm [thread:$0]  (%p915_p12), %s354_s8, 32, %s356_s6, %s327_s30  }
  0xf0 PF: > { %p531_p0 = scmp.ge.s32.totalorder %s808_s22, 2  ;;  %s367_s25 = sand.u32 1, %s768_s12  }
  0xf1   : > { %s368_s15 = scalar_lea.sflag [#allocation6], %s367_s25 }
  0xf2   : > { %p524_p1 = pnand %p531_p0, %p928_p2 }
  0xf4   : > { %p525_p4 = pneg %p524_p1 }
  0xf6   : > { %759 = dma.done.wait (%p525_p4), %s368_s15, 32  }
  0xf7   : > { %761 = vsyncadd (%p525_p4), %s368_s15, 4294967264  ;;  %s378_s23 = scalar_lea.sflag [#allocation9], %s367_s25 }
  0xf8   : > { %763 = dma.done.wait (%p525_p4), %s378_s23, 32  }
  0xf9   : > { %765 = vsyncadd (%p525_p4), %s378_s23, 4294967264  ;;  %s23_s22 = sadd.s32 1, %s808_s22   ;;  %s1051_s7 = sld [smem:[#allocation15_spill]] }
  0xfa   : > { %p20_p5 = scmp.ge.s32.totalorder %s23_s22, 10   ;;  %s1052_s4 = sld [smem:[#allocation16_spill]] }
  0xfb   : > { %s1053_s10 = sld [smem:[#allocation13_spill]]  ;;  %s1055_s12 = smov %s772_s13 }
  0xfc   : > { %s1054_s24 = sld [smem:[#allocation14_spill]]  ;;  %s1056_s13 = smov %s776_s14 }
  0xfd   : > { %s1058_s15 = smov %s784_s16  ;;  %s1059_s16 = smov %s788_s17 }
  0xfe   : > { %s1061_s18 = smov %s800_s20  ;;  %s1062_s19 = smov %s804_s21 }
  0xff   : > { %s1057_s14 = smov %s1051_s7  ;;  %22 = sbr.rel (!%p20_p5) target bundleno = 11 (0xb), region = 101 }
 0x100   : > { %s1060_s17 = smov %s1052_s4 }
 0x101   : > { %s1063_s20 = smov %s1053_s10 }
 0x102   : > { %s1064_s21 = smov %s1054_s24 }
 0x104   :  { %384 = vsyncpa [#allocation5], 1 }
 0x105   :  { %386 = vsyncpa [#allocation5 + $0x1], 1 }
 0x106   :  { %387 = vsyncpa [#allocation6], 1 }
 0x107   :  { %389 = vsyncpa [#allocation6 + $0x1], 1 }
 0x108   :  { %390 = vsyncpa [#allocation9], 1 }
 0x109   :  { %392 = vsyncpa [#allocation9 + $0x1], 1 }

</bundles_post_ra>
